<compile_context>
chip_gen: v7x
topology: tpu7x:2x2x1
jax: 0.10.0
libtpu: 0.0.40
codegen_flags: <defaults>
</compile_context>

<pallas_src>
import jax
import jax.numpy as jnp
from jax.experimental import pallas as pl
from jax.experimental.pallas import tpu as pltpu


# ----------------------------------------------------------------------------
# Parameter setup (matches nn.Parameter init in __init__):
#   log_scale = log(ones(1) * 1e-4)   when initial_scale is None
# ----------------------------------------------------------------------------
def make_log_scale(initial_scale=None):
    if initial_scale is not None:
        return jnp.log(jnp.asarray([initial_scale], dtype=jnp.float32))
    return jnp.log(jnp.ones((1,), dtype=jnp.float32) * 0.0001)


# ----------------------------------------------------------------------------
# forward(): scale = exp(log_scale).  Plain JAX — not worth a kernel launch.
# ----------------------------------------------------------------------------
def surrogate_forward(log_scale, embeddings=None):
    del embeddings  # unused by the reference module as well
    return {"scale": jnp.exp(log_scale)}


# ----------------------------------------------------------------------------
# log_pdf(): the hot path (broadcast, abs, lane reduction, scale normalize)
# ----------------------------------------------------------------------------
def _log_pdf_kernel(params_ref, noisy_ref, cand_ref, out_ref):
    # params_ref: SMEM (2,) f32  -> [inv_scale, log_norm]   (precomputed in wrapper)
    # noisy_ref : VMEM (tb, C, d)      native dtype (bf16 or f32)
    # cand_ref  : VMEM (tb, tz, C, d)  native dtype (bf16 or f32)
    # out_ref   : VMEM (tb, tz, C)     f32
    inv_scale = params_ref[0]
    log_norm = params_ref[1]

    # Upcast per tile: f32 math on every TPU generation (v5e has no bf16 VPU).
    noisy = noisy_ref[...].astype(jnp.float32)               # (tb, C, d)
    cand = cand_ref[...].astype(jnp.float32)                 # (tb, tz, C, d)

    # Single fused expression: broadcast-sub, abs (VPU), lane-axis reduce (XLU).
    abs_sum = jnp.sum(jnp.abs(noisy[:, None, :, :] - cand), axis=-1)   # (tb, tz, C)
    out_ref[...] = log_norm - abs_sum * inv_scale


# ~1M candidate elements per grid step:
#   * bf16 input:  2 MiB HBM tile (x2 double-buffered)  + ~12 MiB f32 temps
#   * f32  input:  4 MiB HBM tile (x2 double-buffered)  + ~12 MiB f32 temps
# -> comfortably under the 32 MiB scoped-VMEM limit on every chip, while each
#    step moves enough bytes to hide the ~0.35 us per-step pipeline overhead.
_TARGET_TILE_ELEMS = 1 << 20


def _pick_tiles(B, Z, C, d, target_elems=_TARGET_TILE_ELEMS):
    """Choose (tb, tz).

    Constraints (from the (8,128) rule on the f32 output block (tb, tz, C)):
      * tz must be a multiple of 8 OR equal to Z (full extent).
      * the grid uses pl.cdiv, so tz does NOT need to divide Z (edge blocks
        are clipped), and tb does not need to divide B.
    """
    row = C * d                                   # elements in one beam row
    if Z * row <= target_elems:
        # Whole beam fits in one tile: fold batch rows to amortize per-step cost.
        tb = max(1, min(B, target_elems // (Z * row)))
        return tb, Z
    if Z < 8:
        # Tiny beam with huge rows: take the full beam (full-extent tz is legal).
        return 1, Z
    tz = max(8, (target_elems // row) // 8 * 8)   # multiple of 8, < Z by construction
    return 1, tz


def surrogate_log_pdf(noisy_embeddings, candidate_embeddings, noise_stats,
                      *, tile_b=None, tile_z=None):
    """Pallas version of IsotropicL1LaplacianSurrogate.log_pdf.

    noisy_embeddings:     [B, C, d]     (bf16 or f32 — streamed in native dtype)
    candidate_embeddings: [B, Z, C, d]  (bf16 or f32 — streamed in native dtype)
    returns:              [B, Z, C]     f32
    """
    B, C, d = noisy_embeddings.shape
    Bc, Z, Cc, dc = candidate_embeddings.shape
    assert (B, C, d) == (Bc, Cc, dc)

    # Scalar math hoisted out of the kernel entirely: one tiny XLA op.
    scale = noise_stats["scale"].astype(jnp.float32).reshape((1,))
    params = jnp.concatenate([1.0 / scale, -jnp.float32(d) * jnp.log(2.0 * scale)])

    tb, tz = _pick_tiles(B, Z, C, d)
    if tile_b is not None:
        tb = tile_b
    if tile_z is not None:
        tz = tile_z

    grid = (pl.cdiv(B, tb), pl.cdiv(Z, tz))
    # NOTE: with small C the output stores are lane-masked, but the output is
    # only ~1/d of the HBM traffic, so we keep the natural (B, Z, C) layout.
    return pl.pallas_call(
        _log_pdf_kernel,
        out_shape=jax.ShapeDtypeStruct((B, Z, C), jnp.float32),
        grid=grid,
        in_specs=[
            pl.BlockSpec(memory_space=pltpu.MemorySpace.SMEM),           # params (2,)
            # noisy block index is constant along the inner zi axis -> stays resident
            pl.BlockSpec((tb, C, d), lambda bi, zi: (bi, 0, 0)),
            pl.BlockSpec((tb, tz, C, d), lambda bi, zi: (bi, zi, 0, 0)),
        ],
        out_specs=pl.BlockSpec((tb, tz, C), lambda bi, zi: (bi, zi, 0)),
        compiler_params=pltpu.CompilerParams(
            dimension_semantics=("parallel", "parallel"),
            vmem_limit_bytes=32 * 1024 * 1024,
        ),
    )(params, noisy_embeddings, candidate_embeddings)


# ----------------------------------------------------------------------------
# Pure-JAX reference for correctness check
# ----------------------------------------------------------------------------
def _log_pdf_ref(noisy, cand, scale):
    noisy = noisy.astype(jnp.float32)
    cand = cand.astype(jnp.float32)
    resid = jnp.abs(noisy[:, None, :, :] - cand)
    abs_sum = jnp.sum(resid, axis=-1)
    d = resid.shape[-1]
    log_norm = -d * jnp.log(2.0 * scale)
    return log_norm - abs_sum / scale


if __name__ == "__main__":
    # Small shapes: batch=2, beam_width=4, num_candidates=8, embedding_dim=128
    B, Z, C, d = 2, 4, 8, 128
    key = jax.random.PRNGKey(0)
    k1, k2, k3 = jax.random.split(key, 3)

    noisy_f32 = jax.random.normal(k1, (B, C, d), dtype=jnp.float32)
    cand_f32 = jax.random.normal(k2, (B, Z, C, d), dtype=jnp.float32)

    log_scale = make_log_scale()                 # log(1e-4), shape (1,)

    # forward pass
    stats = surrogate_forward(log_scale)
    scale = jax.block_until_ready(stats["scale"])
    assert scale.shape == (1,)
    assert jnp.allclose(scale, jnp.exp(log_scale), rtol=1e-6)

    # log_pdf hot path — f32 inputs
    out_f32 = jax.block_until_ready(surrogate_log_pdf(noisy_f32, cand_f32, stats))
    ref_f32 = _log_pdf_ref(noisy_f32, cand_f32, scale)
    assert out_f32.shape == (B, Z, C)
    assert jnp.allclose(out_f32, ref_f32, rtol=1e-4, atol=1e-2), float(
        jnp.max(jnp.abs(out_f32 - ref_f32)))

    # log_pdf hot path — bf16 inputs streamed natively (half the HBM traffic),
    # math still done in f32 inside the kernel.
    noisy_bf16 = noisy_f32.astype(jnp.bfloat16)
    cand_bf16 = cand_f32.astype(jnp.bfloat16)
    out_bf16 = jax.block_until_ready(surrogate_log_pdf(noisy_bf16, cand_bf16, stats))
    ref_bf16 = _log_pdf_ref(noisy_bf16, cand_bf16, scale)
    assert out_bf16.shape == (B, Z, C)
    assert jnp.allclose(out_bf16, ref_bf16, rtol=1e-4, atol=1e-2), float(
        jnp.max(jnp.abs(out_bf16 - ref_bf16)))

    # Ragged-tile path: Z not a multiple of the forced z-tile -> cdiv grid with
    # a clipped partial edge block.  Validates the non-divisor tiling on HW.
    Zr = 12
    noisy_r = jax.random.normal(k3, (B, C, d), dtype=jnp.float32)
    cand_r = jax.random.normal(k2, (B, Zr, C, d), dtype=jnp.float32)
    out_r = jax.block_until_ready(
        surrogate_log_pdf(noisy_r, cand_r, stats, tile_b=1, tile_z=8))
    ref_r = _log_pdf_ref(noisy_r, cand_r, scale)
    assert out_r.shape == (B, Zr, C)
    assert jnp.allclose(out_r, ref_r, rtol=1e-4, atol=1e-2), float(
        jnp.max(jnp.abs(out_r - ref_r)))

    print("KERNEL_OK")
</pallas_src>

<mosaic_0001>
module attributes {stable_mosaic.version = 11 : i64} {
  func.func @_log_pdf_kernel(%arg0: i32, %arg1: i32, %arg2: memref<2xf32, #tpu.memory_space<smem>>, %arg3: memref<2x8x128xf32, #tpu.memory_space<vmem>>, %arg4: memref<2x4x8x128xf32, #tpu.memory_space<vmem>>, %arg5: memref<2x4x8xf32, #tpu.memory_space<vmem>>) attributes {dimension_semantics = [#tpu.dimension_semantics<parallel>, #tpu.dimension_semantics<parallel>], iteration_bounds = array<i64: 1, 1>, scalar_prefetch = 0 : i64, scratch_operands = 0 : i64, tpu.core_type = #tpu.core_type<tc>, window_params = [{transform_indices = @transform_0, window_bounds = array<i64: 2>}, {transform_indices = @transform_1, window_bounds = array<i64: 2, 8, 128>}, {transform_indices = @transform_2, window_bounds = array<i64: 2, 4, 8, 128>}, {transform_indices = @transform_3, window_bounds = array<i64: 2, 4, 8>}]} {
    %c0 = arith.constant 0 : index
    %0 = memref.load %arg2[%c0] : memref<2xf32, #tpu.memory_space<smem>>
    %c1 = arith.constant 1 : index
    %1 = memref.load %arg2[%c1] : memref<2xf32, #tpu.memory_space<smem>>
    %c0_0 = arith.constant 0 : index
    %c0_1 = arith.constant 0 : index
    %c0_2 = arith.constant 0 : index
    %2 = vector.load %arg3[%c0_0, %c0_1, %c0_2] : memref<2x8x128xf32, #tpu.memory_space<vmem>>, vector<2x8x128xf32>
    %c0_3 = arith.constant 0 : index
    %c0_4 = arith.constant 0 : index
    %c0_5 = arith.constant 0 : index
    %c0_6 = arith.constant 0 : index
    %3 = vector.load %arg4[%c0_3, %c0_4, %c0_5, %c0_6] : memref<2x4x8x128xf32, #tpu.memory_space<vmem>>, vector<2x4x8x128xf32>
    %4 = vector.shape_cast %2 : vector<2x8x128xf32> to vector<2x1x8x128xf32>
    %5 = vector.broadcast %4 : vector<2x1x8x128xf32> to vector<2x4x8x128xf32>
    %6 = arith.subf %5, %3 : vector<2x4x8x128xf32>
    %7 = math.absf %6 : vector<2x4x8x128xf32>
    %cst = arith.constant dense<0.000000e+00> : vector<2x4x8xf32>
    %8 = vector.multi_reduction <add>, %7, %cst [3] : vector<2x4x8x128xf32> to vector<2x4x8xf32>
    %9 = vector.broadcast %0 : f32 to vector<2x4x8xf32>
    %10 = arith.mulf %8, %9 : vector<2x4x8xf32>
    %11 = vector.broadcast %1 : f32 to vector<2x4x8xf32>
    %12 = arith.subf %11, %10 : vector<2x4x8xf32>
    %c0_7 = arith.constant 0 : index
    %c0_8 = arith.constant 0 : index
    %c0_9 = arith.constant 0 : index
    %13 = vector.load %arg5[%c0_7, %c0_8, %c0_9] : memref<2x4x8xf32, #tpu.memory_space<vmem>>, vector<2x4x8xf32>
    tpu.vector_store %arg5[%c0_7, %c0_8, %c0_9], %12 {strides = array<i32>} : memref<2x4x8xf32, #tpu.memory_space<vmem>>, vector<2x4x8xf32>,
    return
  }
  func.func @transform_0(%arg0: i32, %arg1: i32) -> i32 {
    %c0_i32 = arith.constant 0 : i32
    %c0_i32_0 = arith.constant 0 : i32
    return %c0_i32 : i32
  }
  func.func @transform_1(%arg0: i32, %arg1: i32) -> (i32, i32, i32) {
    %c0_i32 = arith.constant 0 : i32
    %c0_i32_0 = arith.constant 0 : i32
    %c0_i32_1 = arith.constant 0 : i32
    return %arg0, %c0_i32, %c0_i32_0 : i32, i32, i32
  }
  func.func @transform_2(%arg0: i32, %arg1: i32) -> (i32, i32, i32, i32) {
    %c0_i32 = arith.constant 0 : i32
    %c0_i32_0 = arith.constant 0 : i32
    %c0_i32_1 = arith.constant 0 : i32
    return %arg0, %arg1, %c0_i32, %c0_i32_0 : i32, i32, i32, i32
  }
  func.func @transform_3(%arg0: i32, %arg1: i32) -> (i32, i32, i32) {
    %c0_i32 = arith.constant 0 : i32
    %c0_i32_0 = arith.constant 0 : i32
    return %arg0, %arg1, %c0_i32 : i32, i32, i32
  }
}

</mosaic_0001>

<bundles_post_ra>
// kernel: tpu_custom_call.1
= control target key start
LH: loop header
LB: loop body
LE: loop exit
PB: predicated region body
PF: predicated region fallthrough
CT: control target
= control target key end

     0   :  { %8 = vsyncpa [#allocation5], 0  ;;  %s362_s0 = inlined_call_operand.hbm [shape: f32[2], index: 0, kind: input, shape index: {}]   ;;  %s363_s1 = inlined_call_operand.hbm [shape: f32[2,8,128], index: 1, kind: input, shape index: {}]   ;;  %s364_s2 = inlined_call_operand.hbm [shape: f32[2,4,8,128], index: 2, kind: input, shape index: {}]   ;;  %s365_s3 = inlined_call_operand.hbm [shape: f32[2,4,8], index: 3, kind: output, shape index: {}]  }
   0x1   :  { %9 = vsyncpa [#allocation3], 0 }
   0x2   :  { %10 = vsyncpa [#allocation8], 0 }
   0x3   :  { %11 = vsyncpa [#allocation4], 0  ;;  %s200_s14 = scalar_lea.hbm %s362_s0, 16 }
   0x4   :  { %p201_p0 = scmp.ne.s32.totalorder %s362_s0, %s200_s14  ;;  %p204_p1 = scmp.lt.u32.totalorder %s200_s14, %s362_s0 }
   0x6   :  { %p206_p2 = pnand %p204_p1, %p201_p0 }
   0x8   :  { %209 = shalt.err (!%p206_p2)
}
   0x9   :  { %s284_s19 = smov [#allocation2]   ;;  %s285_s22 = smov [#allocation6]  }
   0xa   :  { %19 = dma.hbm_to_smem %s362_s0, 16, %s284_s19, [#allocation5]  }
   0xb   :  { %s25_s23 = sshll.u32 %s285_s22, 4  ;;  %s210_s26 = scalar_lea.hbm %s363_s1, 256  ;;  %s26_s23 = int_to_ptr.vmem [resolvable:$true] %s25_s23 }
   0xc   :  { %p211_p3 = scmp.ne.s32.totalorder %s363_s1, %s210_s26  ;;  %p214_p4 = scmp.lt.u32.totalorder %s210_s26, %s363_s1 }
   0xe   :  { %p216_p5 = pnand %p214_p4, %p211_p3 }
  0x10   :  { %219 = shalt.err (!%p216_p5)
}
  0x11   :  { %s220_s4 = scalar_lea.vmem %s26_s23, 256  ;;  %p225_p7 = scmp.lt.s32.totalorder %s26_s23, %s26_s23 }
  0x12   :  { %p221_p6 = scmp.ne.s32.totalorder %s26_s23, %s220_s4  ;;  %p226_p8 = scmp.lt.s32.totalorder %s220_s4, %s220_s4 }
  0x14   :  { %p227_p9 = por %p226_p8, %p225_p7 }
  0x16   :  { %p228_p10 = pnand %p227_p9, %p221_p6 }
  0x18   :  { %231 = shalt.err (!%p228_p10)
}
  0x19   :  { %s286_s0 = smov 128   ;;  %s287_s5 = smov 8  }
  0x1a   :  { %31 = dma.hbm_to_vmem [thread:$0]  %s363_s1, 256, %s26_s23, [#allocation3], %s286_s0, %s286_s0, %s287_s5  }
  0x1b   :  { %s288_s8 = smov [#allocation7]   ;;  %s232_s12 = scalar_lea.hbm %s364_s2, 1024 }
  0x1c   :  { %s37_s9 = sshll.u32 %s288_s8, 4  ;;  %p233_p11 = scmp.ne.s32.totalorder %s364_s2, %s232_s12  ;;  %s38_s9 = int_to_ptr.vmem [resolvable:$true] %s37_s9 }
  0x1d   :  { %p236_p12 = scmp.lt.u32.totalorder %s232_s12, %s364_s2 }
  0x1f   :  { %p238_p13 = pnand %p236_p12, %p233_p11 }
  0x21   :  { %241 = shalt.err (!%p238_p13)
}
  0x22   :  { %s242_s17 = scalar_lea.vmem %s38_s9, 1024  ;;  %p247_p1 = scmp.lt.s32.totalorder %s38_s9, %s38_s9 }
  0x23   :  { %p243_p0 = scmp.ne.s32.totalorder %s38_s9, %s242_s17  ;;  %p248_p2 = scmp.lt.s32.totalorder %s242_s17, %s242_s17 }
  0x25   :  { %p249_p3 = por %p248_p2, %p247_p1 }
  0x27   :  { %p250_p4 = pnand %p249_p3, %p243_p0 }
  0x29   :  { %253 = shalt.err (!%p250_p4)
}
  0x2a   :  { %43 = dma.hbm_to_vmem [thread:$0]  %s364_s2, 1024, %s38_s9, [#allocation8], %s286_s0, %s286_s0, %s287_s5  }
  0x2b   :  { %276 = dma.done.wait [#allocation5], 16  }
  0x2c   :  { %277 = vsyncadd [#allocation5], 4294967280 }
  0x2d   :  { %278 = dma.done.wait [#allocation3], 256  }
  0x2e   :  { %279 = vsyncadd [#allocation3], 4294967040 }
  0x2f   :  { %280 = dma.done.wait [#allocation8], 1024  }
  0x30   :  { %281 = vsyncadd [#allocation8], 4294966272 }
  0x31   :  { %53 = sfence }
  0x32   :  { %v57_v0 = vld [vmem:[#allocation6 + $0x8] sm:$0xff]  ;;  %v62_v1 = vld [vmem:[#allocation7 + $0x20] sm:$0xff]  ;;  %v56_v2 = vld [vmem:[#allocation6] sm:$0xff]  ;;  %s54_s2 = sld [smem:[#allocation2]]  ;;  %s191_s19 = sld [smem:[#allocation2 + $0x1]]  ;;  %v124_v28 = vlaneseq  ;;  %vm158_vm0 = vcmask 1041409  }
  0x33   :  { %v70_v3 = vsub.f32 %v57_v0, %v62_v1  ;;  %v58_v4 = vld [vmem:[#allocation7] sm:$0xff]  ;;  %v63_v5 = vld [vmem:[#allocation7 + $0x28] sm:$0xff]  ;;  %v64_v10 = vld [vmem:[#allocation7 + $0x30] sm:$0xff]  ;;  %vm160_vm1 = vcmask 1042434   ;;  %s289_s20 = smov [#allocation9]   ;;  %vm162_vm2 = vcmask 1043459  }
  0x34   :  { %v59_v6 = vld [vmem:[#allocation7 + $0x8] sm:$0xff]  ;;  %v66_v7 = vsub.f32 %v56_v2, %v58_v4  ;;  %v71_v8 = vsub.f32 %v57_v0, %v63_v5  ;;  %v60_v12 = vld [vmem:[#allocation7 + $0x10] sm:$0xff]  ;;  %v72_v15 = vsub.f32 %v57_v0, %v64_v10  ;;  %v65_v18 = vld [vmem:[#allocation7 + $0x38] sm:$0xff]  ;;  %v125_v34 = vand.u32 127, %v124_v28  ;;  %s177_s21 = sshll.u32 %s289_s20, 4  ;;  %s178_s21 = int_to_ptr.vmem [resolvable:$true] %s177_s21 }
  0x35   :  { %v67_v9 = vsub.f32 %v56_v2, %v59_v6  ;;  %v78_v11 = vand.u32 2147483647, %v70_v3  ;;  %v68_v17 = vsub.f32 %v56_v2, %v60_v12  ;;  %v61_v19 = vld [vmem:[#allocation7 + $0x18] sm:$0xff]  ;;  %v73_v21 = vsub.f32 %v57_v0, %v65_v18  ;;  %s254_s22 = scalar_lea.vmem %s178_s21, 128  ;;  %p259_p6 = scmp.lt.s32.totalorder %s178_s21, %s178_s21 }
  0x36   :  { %v74_v13 = vand.u32 2147483647, %v66_v7  ;;  %v79_v14 = vand.u32 2147483647, %v71_v8  ;;  %v80_v20 = vand.u32 2147483647, %v72_v15  ;;  %v69_v23 = vsub.f32 %v56_v2, %v61_v19  ;;  %p255_p5 = scmp.ne.s32.totalorder %s178_s21, %s254_s22  ;;  %p260_p7 = scmp.lt.s32.totalorder %s254_s22, %s254_s22 }
  0x37   :  { %90 = vadd.xlane.f32.xlu1 %v78_v11  ;;  %v75_v16 = vand.u32 2147483647, %v67_v9  ;;  %v76_v22 = vand.u32 2147483647, %v68_v17  ;;  %v81_v24 = vand.u32 2147483647, %v73_v21 }
  0x38   :  { %82 = vadd.xlane.f32.xlu0 %v74_v13  ;;  %v77_v25 = vand.u32 2147483647, %v69_v23  ;;  %v98_v29 = vstv %s54_s2  ;;  %v127_v35 = vshrl.u32 %v124_v28, 7  ;;  %v107_v37 = vstv %s191_s19  ;;  %p261_p8 = por %p260_p7, %p259_p6 }
  0x39   :  { %vm169_vm3 = vcmask 60416  }
  0x3a   :  { %v128_v45 = vsub.s32 %v125_v34, %v127_v35  ;;  %p262_p9 = pnand %p261_p8, %p255_p5 }
  0x3b   :  { %92 = vadd.xlane.f32.xlu1 %v79_v14 }
  0x3c   :  { %84 = vadd.xlane.f32.xlu0 %v75_v16 }
  0x3f   :  { %94 = vadd.xlane.f32.xlu1 %v80_v20 }
  0x40   :  { %86 = vadd.xlane.f32.xlu0 %v76_v22 }
  0x43   :  { %96 = vadd.xlane.f32.xlu1 %v81_v24 }
  0x44   :  { %88 = vadd.xlane.f32.xlu0 %v77_v25 }
  0xc4   :  { %v91_v26 = vpop.xlane.xlu1 %90 }
  0xc5   :  { %v83_v27 = vpop.xlane.xlu0 %82  ;;  %v103_v36 = vmul.f32 %v98_v29, %v91_v26 }
  0xc6   :  { %v99_v38 = vmul.f32 %v98_v29, %v83_v27 }
  0xc7   :  { %v112_v46 = vsub.f32 %v107_v37, %v103_v36 }
  0xc8   :  { %v93_v30 = vpop.xlane.xlu1 %92  ;;  %v108_v48 = vsub.f32 %v107_v37, %v99_v38 }
  0xc9   :  { %v104_v31 = vmul.f32 %v98_v29, %v93_v30  ;;  %v85_v32 = vpop.xlane.xlu0 %84  ;;  %v145_v57 = vrot.slane %v112_v46, %v128_v45 }
  0xca   :  { %v100_v33 = vmul.f32 %v98_v29, %v85_v32  ;;  %v129_v60 = vrot.slane %v108_v48, %v128_v45 }
  0xcb   :  { %v113_v40 = vsub.f32 %v107_v37, %v104_v31 }
  0xcc   :  { %v95_v39 = vpop.xlane.xlu1 %94  ;;  %v109_v43 = vsub.f32 %v107_v37, %v100_v33 }
  0xcd   :  { %v105_v41 = vmul.f32 %v98_v29, %v95_v39  ;;  %v87_v42 = vpop.xlane.xlu0 %86  ;;  %v149_v51 = vrot.slane %v113_v40, %v128_v45 }
  0xce   :  { %v101_v44 = vmul.f32 %v98_v29, %v87_v42  ;;  %v133_v54 = vrot.slane %v109_v43, %v128_v45 }
  0xcf   :  { %v114_v47 = vsub.f32 %v107_v37, %v105_v41  ;;  %v164_v62 = vsel %vm158_vm0, %v149_v51, %v145_v57 }
  0xd0   :  { %v110_v49 = vsub.f32 %v107_v37, %v101_v44  ;;  %v97_v50 = vpop.xlane.xlu1 %96  ;;  %v159_v0 = vsel %vm158_vm0, %v133_v54, %v129_v60 }
  0xd1   :  { %v106_v52 = vmul.f32 %v98_v29, %v97_v50  ;;  %v89_v53 = vpop.xlane.xlu0 %88  ;;  %v153_v55 = vrot.slane %v114_v47, %v128_v45 }
  0xd2   :  { %v102_v56 = vmul.f32 %v98_v29, %v89_v53  ;;  %v137_v58 = vrot.slane %v110_v49, %v128_v45 }
  0xd3   :  { %v115_v59 = vsub.f32 %v107_v37, %v106_v52  ;;  %v165_v2 = vsel %vm160_vm1, %v153_v55, %v164_v62 }
  0xd4   :  { %v111_v61 = vsub.f32 %v107_v37, %v102_v56  ;;  %v161_v3 = vsel %vm160_vm1, %v137_v58, %v159_v0 }
  0xd5   :  { %v157_v63 = vrot.slane %v115_v59, %v128_v45 }
  0xd6   :  { %v141_v1 = vrot.slane %v111_v61, %v128_v45 }
  0xd7   :  { %v166_v4 = vsel %vm162_vm2, %v157_v63, %v165_v2 }
  0xd8   :  { %v163_v5 = vsel %vm162_vm2, %v141_v1, %v161_v3  ;;  %171 = vst.msk [vmem:[#allocation9 + $0x4] sm:$0xf] %vm169_vm3, %v166_v4 }
  0xd9   :  { %170 = vst.msk [vmem:[#allocation9] sm:$0xf] %vm169_vm3, %v163_v5 }
  0xda   :  { %265 = shalt.err (!%p262_p9)
}
  0xdb   :  { %s266_s25 = scalar_lea.hbm %s365_s3, 128 }
  0xdc   :  { %p267_p10 = scmp.ne.s32.totalorder %s365_s3, %s266_s25  ;;  %p270_p11 = scmp.lt.u32.totalorder %s266_s25, %s365_s3 }
  0xde   :  { %p272_p12 = pnand %p270_p11, %p267_p10 }
  0xe0   :  { %275 = shalt.err (!%p272_p12)
}
  0xe1   :  { %s290_s30 = smov 64   ;;  %s291_s4 = smov 4  }
  0xe2   :  { %183 = dma.vmem_to_hbm [thread:$0]  %s178_s21, 128, %s365_s3, [#allocation4], %s290_s30, %s290_s30, %s291_s4  }
  0xe3   :  { %282 = dma.done.wait [#allocation4], 128  }
  0xe4   :  { %283 = vsyncadd [#allocation4], 4294967168 }
  0xe5   :  { %187 = vsyncpa [#allocation3], 1 }
  0xe6   :  { %188 = vsyncpa [#allocation8], 1 }
  0xe7   :  { %189 = vsyncpa [#allocation4], 1 }
  0xe8   :  { %190 = vsyncpa [#allocation5], 1 }

</bundles_post_ra>
